<compile_context>
chip_gen: v7x
topology: tpu7x:2x2x1
jax: 0.10.0
libtpu: 0.0.40
codegen_flags: <defaults>
</compile_context>

<pallas_src>
import functools

import jax
import jax.numpy as jnp
from jax.experimental import pallas as pl
from jax.experimental.pallas import tpu as pltpu

_LANE = 128
_SUBLANE = 8


def _round_up(x, m):
    return ((x + m - 1) // m) * m


def actor_kernel(x_ref, w1_ref, b1_ref, w2_ref, b2_ref, w3_ref, b3_ref,
                 mean_ref):
    bf16 = jnp.bfloat16

    # fc1 + relu  (bf16 MXU operands, f32 accumulate / elementwise)
    h1 = jnp.dot(x_ref[...].astype(bf16), w1_ref[...],
                 preferred_element_type=jnp.float32)
    h1 = jnp.maximum(h1 + b1_ref[...], 0.0)

    # fc2 + relu
    h2 = jnp.dot(h1.astype(bf16), w2_ref[...],
                 preferred_element_type=jnp.float32)
    h2 = jnp.maximum(h2 + b2_ref[...], 0.0)

    # fc3 + tanh
    h3 = jnp.dot(h2.astype(bf16), w3_ref[...],
                 preferred_element_type=jnp.float32)
    mean_ref[...] = jnp.tanh(h3 + b3_ref[...]).astype(mean_ref.dtype)


def prepare_params(params):
    """One-time prep: zero-pad all feature dims to multiples of 128 and cast the
    weights to bf16 for the MXU.  Biases stay f32 (the bias add / relu / tanh
    path runs in f32 on the VPU/EUP).  Zero padding is exact: padded input
    features hit zero weight rows, padded hidden units get zero weight + zero
    bias -> relu(0)=0 and feed zero weight rows downstream, padded action lanes
    are sliced off by the wrapper."""
    w1, b1 = params["w1"], params["b1"]
    w2, b2 = params["w2"], params["b2"]
    w3, b3 = params["w3"], params["b3"]

    S, H = w1.shape
    A = w3.shape[1]
    Sp, Hp, Ap = (_round_up(d, _LANE) for d in (S, H, A))

    def pad2(a, r, c):
        return jnp.pad(a, ((0, r - a.shape[0]), (0, c - a.shape[1])))

    prepped = {
        "w1": pad2(w1, Sp, Hp).astype(jnp.bfloat16),
        "b1": pad2(b1, 1, Hp),
        "w2": pad2(w2, Hp, Hp).astype(jnp.bfloat16),
        "b2": pad2(b2, 1, Hp),
        "w3": pad2(w3, Hp, Ap).astype(jnp.bfloat16),
        "b3": pad2(b3, 1, Ap),
    }
    return prepped, A


@functools.partial(jax.jit, static_argnames=("action_dim", "tile_b"))
def actor_forward(state, prepped, *, action_dim, tile_b=512):
    """state: [B, state_dim] f32.  prepped: output of prepare_params.

    Returns (action_mean [B, action_dim] f32, std [B, action_dim] f32)."""
    B, S = state.shape
    Sp, Hp = prepped["w1"].shape
    Ap = prepped["w3"].shape[1]

    # Batch tile: big enough to fill the MXU M dimension / amortize per-step
    # overhead, but capped so the grid has >= 2 steps whenever B >= 16 (lets
    # the "parallel" batch axis use both TensorCores on v7x).
    tb_target = max(_SUBLANE, _round_up(-(-B // 2), _SUBLANE))
    tb = _round_up(min(tile_b, tb_target), _SUBLANE)
    Bp = _round_up(B, tb)
    grid = (Bp // tb,)

    xp = jnp.pad(state, ((0, Bp - B), (0, Sp - S)))

    def batch_spec(shape):
        return pl.BlockSpec(shape, lambda i: (i, 0))

    def pinned(shape):
        # Block index never changes -> single-buffer (no wasted VMEM copy).
        return pl.BlockSpec(shape, lambda i: (0, 0), pipeline_mode=pl.Buffered(1))

    # VMEM budget: bf16 weights + f32 biases (single-buffered), double-buffered
    # x/mean tiles, plus headroom for the f32 intermediates and bf16 staging.
    weight_vmem = 2 * (Sp * Hp + Hp * Hp + Hp * Ap) + 4 * (2 * Hp + Ap)
    act_vmem = 2 * tb * (Sp + Ap) * 4
    inter_vmem = 6 * tb * Hp * 4
    vmem_limit = int(max(32 << 20,
                         min(64 << 20,
                             weight_vmem + act_vmem + inter_vmem + (2 << 20))))

    flops = 2 * Bp * (Sp * Hp + Hp * Hp + Hp * Ap)
    bytes_accessed = (Bp * Sp * 4                         # x
                      + 2 * (Sp * Hp + Hp * Hp + Hp * Ap)  # bf16 weights
                      + 4 * (2 * Hp + Ap)                  # f32 biases
                      + Bp * Ap * 4)                       # mean out
    cost = pl.CostEstimate(flops=flops, transcendentals=Bp * Ap,
                           bytes_accessed=bytes_accessed)

    mean_p = pl.pallas_call(
        actor_kernel,
        out_shape=jax.ShapeDtypeStruct((Bp, Ap), jnp.float32),
        grid=grid,
        in_specs=[
            batch_spec((tb, Sp)),                 # x: one batch tile per step
            pinned((Sp, Hp)), pinned((1, Hp)),    # w1 (bf16), b1 (f32)
            pinned((Hp, Hp)), pinned((1, Hp)),    # w2, b2
            pinned((Hp, Ap)), pinned((1, Ap)),    # w3, b3
        ],
        out_specs=batch_spec((tb, Ap)),           # lane-dense (Ap mult of 128)
        compiler_params=pltpu.CompilerParams(
            dimension_semantics=("parallel",),
            vmem_limit_bytes=vmem_limit),
        cost_estimate=cost,
    )(xp, prepped["w1"], prepped["b1"], prepped["w2"], prepped["b2"],
      prepped["w3"], prepped["b3"])

    action_mean = mean_p[:B, :action_dim]
    std = jnp.ones_like(action_mean)  # constant (torch.ones_like); no kernel writeback
    return action_mean, std


def init_params(key, state_dim, action_dim, hidden_dim):
    """Deterministic init mimicking nn.Linear's U(-1/sqrt(fan_in), 1/sqrt(fan_in))."""
    ks = jax.random.split(key, 6)

    def linear(kw, kb, fan_in, fan_out):
        bound = 1.0 / jnp.sqrt(fan_in)
        w = jax.random.uniform(kw, (fan_in, fan_out), jnp.float32, -bound, bound)
        b = jax.random.uniform(kb, (1, fan_out), jnp.float32, -bound, bound)
        return w, b

    w1, b1 = linear(ks[0], ks[1], state_dim, hidden_dim)
    w2, b2 = linear(ks[2], ks[3], hidden_dim, hidden_dim)
    w3, b3 = linear(ks[4], ks[5], hidden_dim, action_dim)
    return {"w1": w1, "b1": b1, "w2": w2, "b2": b2, "w3": w3, "b3": b3}


if __name__ == "__main__":
    state_dim, action_dim, hidden_dim = 16, 4, 32

    key = jax.random.PRNGKey(0)
    k_params, k_state = jax.random.split(key)
    params = init_params(k_params, state_dim, action_dim, hidden_dim)
    prepped, a_dim = prepare_params(params)  # one-time pad + bf16 cast

    def ref_fwd(x, p, cast):
        c = (lambda a: a.astype(jnp.bfloat16)) if cast else (lambda a: a)
        h1 = jnp.maximum(
            jnp.dot(c(x), c(p["w1"]), preferred_element_type=jnp.float32) + p["b1"], 0.0)
        h2 = jnp.maximum(
            jnp.dot(c(h1), c(p["w2"]), preferred_element_type=jnp.float32) + p["b2"], 0.0)
        return jnp.tanh(
            jnp.dot(c(h2), c(p["w3"]), preferred_element_type=jnp.float32) + p["b3"])

    # batch=8: single grid step; batch=40: batch padding + 2 grid steps (both
    # v7x TensorCores exercised via the "parallel" batch axis).
    for batch in (8, 40):
        state = jax.random.normal(jax.random.fold_in(k_state, batch),
                                  (batch, state_dim), dtype=jnp.float32)
        action_mean, std = actor_forward(state, prepped, action_dim=a_dim)
        jax.block_until_ready((action_mean, std))

        assert action_mean.shape == (batch, action_dim)
        assert std.shape == (batch, action_dim)
        assert jnp.allclose(action_mean, ref_fwd(state, params, True),
                            atol=2e-3), "mean mismatch (bf16 ref)"
        assert jnp.allclose(action_mean, ref_fwd(state, params, False),
                            atol=5e-2), "mean mismatch (f32 ref)"
        assert jnp.all(std == 1.0), "std mismatch"

    print("KERNEL_OK")
</pallas_src>

<mosaic_0001>
module attributes {stable_mosaic.version = 11 : i64} {
  func.func @actor_kernel(%arg0: i32, %arg1: memref<8x128xf32, #tpu.memory_space<vmem>>, %arg2: memref<128x128xbf16, #tpu.memory_space<vmem>>, %arg3: memref<1x128xf32, #tpu.memory_space<vmem>>, %arg4: memref<128x128xbf16, #tpu.memory_space<vmem>>, %arg5: memref<1x128xf32, #tpu.memory_space<vmem>>, %arg6: memref<128x128xbf16, #tpu.memory_space<vmem>>, %arg7: memref<1x128xf32, #tpu.memory_space<vmem>>, %arg8: memref<8x128xf32, #tpu.memory_space<vmem>>) attributes {dimension_semantics = [#tpu.dimension_semantics<parallel>], iteration_bounds = array<i64: 1>, scalar_prefetch = 0 : i64, scratch_operands = 0 : i64, tpu.core_type = #tpu.core_type<tc>, window_params = [{transform_indices = @transform_0, window_bounds = array<i64: 8, 128>}, {pipeline_mode = #tpu.pipeline_mode<synchronous>, transform_indices = @transform_1, window_bounds = array<i64: 128, 128>}, {pipeline_mode = #tpu.pipeline_mode<synchronous>, transform_indices = @transform_2, window_bounds = array<i64: 1, 128>}, {pipeline_mode = #tpu.pipeline_mode<synchronous>, transform_indices = @transform_3, window_bounds = array<i64: 128, 128>}, {pipeline_mode = #tpu.pipeline_mode<synchronous>, transform_indices = @transform_4, window_bounds = array<i64: 1, 128>}, {pipeline_mode = #tpu.pipeline_mode<synchronous>, transform_indices = @transform_5, window_bounds = array<i64: 128, 128>}, {pipeline_mode = #tpu.pipeline_mode<synchronous>, transform_indices = @transform_6, window_bounds = array<i64: 1, 128>}, {transform_indices = @transform_7, window_bounds = array<i64: 8, 128>}]} {
    %c0 = arith.constant 0 : index
    %c0_0 = arith.constant 0 : index
    %0 = vector.load %arg1[%c0, %c0_0] : memref<8x128xf32, #tpu.memory_space<vmem>>, vector<8x128xf32>
    %1 = arith.truncf %0 : vector<8x128xf32> to vector<8x128xbf16>
    %c0_1 = arith.constant 0 : index
    %c0_2 = arith.constant 0 : index
    %2 = vector.load %arg2[%c0_1, %c0_2] : memref<128x128xbf16, #tpu.memory_space<vmem>>, vector<128x128xbf16>
    %cst = arith.constant dense<0.000000e+00> : vector<8x128xf32>
    %3 = tpu.matmul %1, %2, %cst {dimension_numbers = #tpu.dot_dimension_numbers<[1], [0], [0], [1], [0, 0, 1, 1], [], []>} : vector<8x128xbf16>, vector<128x128xbf16>, vector<8x128xf32> -> vector<8x128xf32>
    %c0_3 = arith.constant 0 : index
    %c0_4 = arith.constant 0 : index
    %4 = vector.load %arg3[%c0_3, %c0_4] : memref<1x128xf32, #tpu.memory_space<vmem>>, vector<1x128xf32>
    %5 = vector.broadcast %4 : vector<1x128xf32> to vector<8x128xf32>
    %6 = arith.addf %3, %5 : vector<8x128xf32>
    %cst_5 = arith.constant 0.000000e+00 : f32
    %7 = vector.broadcast %cst_5 : f32 to vector<8x128xf32>
    %8 = arith.maximumf %6, %7 : vector<8x128xf32>
    %9 = arith.truncf %8 : vector<8x128xf32> to vector<8x128xbf16>
    %c0_6 = arith.constant 0 : index
    %c0_7 = arith.constant 0 : index
    %10 = vector.load %arg4[%c0_6, %c0_7] : memref<128x128xbf16, #tpu.memory_space<vmem>>, vector<128x128xbf16>
    %cst_8 = arith.constant dense<0.000000e+00> : vector<8x128xf32>
    %11 = tpu.matmul %9, %10, %cst_8 {dimension_numbers = #tpu.dot_dimension_numbers<[1], [0], [0], [1], [0, 0, 1, 1], [], []>} : vector<8x128xbf16>, vector<128x128xbf16>, vector<8x128xf32> -> vector<8x128xf32>
    %c0_9 = arith.constant 0 : index
    %c0_10 = arith.constant 0 : index
    %12 = vector.load %arg5[%c0_9, %c0_10] : memref<1x128xf32, #tpu.memory_space<vmem>>, vector<1x128xf32>
    %13 = vector.broadcast %12 : vector<1x128xf32> to vector<8x128xf32>
    %14 = arith.addf %11, %13 : vector<8x128xf32>
    %cst_11 = arith.constant 0.000000e+00 : f32
    %15 = vector.broadcast %cst_11 : f32 to vector<8x128xf32>
    %16 = arith.maximumf %14, %15 : vector<8x128xf32>
    %17 = arith.truncf %16 : vector<8x128xf32> to vector<8x128xbf16>
    %c0_12 = arith.constant 0 : index
    %c0_13 = arith.constant 0 : index
    %18 = vector.load %arg6[%c0_12, %c0_13] : memref<128x128xbf16, #tpu.memory_space<vmem>>, vector<128x128xbf16>
    %cst_14 = arith.constant dense<0.000000e+00> : vector<8x128xf32>
    %19 = tpu.matmul %17, %18, %cst_14 {dimension_numbers = #tpu.dot_dimension_numbers<[1], [0], [0], [1], [0, 0, 1, 1], [], []>} : vector<8x128xbf16>, vector<128x128xbf16>, vector<8x128xf32> -> vector<8x128xf32>
    %c0_15 = arith.constant 0 : index
    %c0_16 = arith.constant 0 : index
    %20 = vector.load %arg7[%c0_15, %c0_16] : memref<1x128xf32, #tpu.memory_space<vmem>>, vector<1x128xf32>
    %21 = vector.broadcast %20 : vector<1x128xf32> to vector<8x128xf32>
    %22 = arith.addf %19, %21 : vector<8x128xf32>
    %23 = math.tanh %22 : vector<8x128xf32>
    %c0_17 = arith.constant 0 : index
    %c0_18 = arith.constant 0 : index
    %24 = vector.load %arg8[%c0_17, %c0_18] : memref<8x128xf32, #tpu.memory_space<vmem>>, vector<8x128xf32>
    tpu.vector_store %arg8[%c0_17, %c0_18], %23 {strides = array<i32>} : memref<8x128xf32, #tpu.memory_space<vmem>>, vector<8x128xf32>,
    return
  }
  func.func @transform_0(%arg0: i32) -> (i32, i32) {
    %c0_i32 = arith.constant 0 : i32
    %c0_i32_0 = arith.constant 0 : i32
    return %arg0, %c0_i32 : i32, i32
  }
  func.func @transform_1(%arg0: i32) -> (i32, i32) {
    %c0_i32 = arith.constant 0 : i32
    %c0_i32_0 = arith.constant 0 : i32
    %c0_i32_1 = arith.constant 0 : i32
    return %c0_i32, %c0_i32_0 : i32, i32
  }
  func.func @transform_2(%arg0: i32) -> (i32, i32) {
    %c0_i32 = arith.constant 0 : i32
    %c0_i32_0 = arith.constant 0 : i32
    %c0_i32_1 = arith.constant 0 : i32
    return %c0_i32, %c0_i32_0 : i32, i32
  }
  func.func @transform_3(%arg0: i32) -> (i32, i32) {
    %c0_i32 = arith.constant 0 : i32
    %c0_i32_0 = arith.constant 0 : i32
    %c0_i32_1 = arith.constant 0 : i32
    return %c0_i32, %c0_i32_0 : i32, i32
  }
  func.func @transform_4(%arg0: i32) -> (i32, i32) {
    %c0_i32 = arith.constant 0 : i32
    %c0_i32_0 = arith.constant 0 : i32
    %c0_i32_1 = arith.constant 0 : i32
    return %c0_i32, %c0_i32_0 : i32, i32
  }
  func.func @transform_5(%arg0: i32) -> (i32, i32) {
    %c0_i32 = arith.constant 0 : i32
    %c0_i32_0 = arith.constant 0 : i32
    %c0_i32_1 = arith.constant 0 : i32
    return %c0_i32, %c0_i32_0 : i32, i32
  }
  func.func @transform_6(%arg0: i32) -> (i32, i32) {
    %c0_i32 = arith.constant 0 : i32
    %c0_i32_0 = arith.constant 0 : i32
    %c0_i32_1 = arith.constant 0 : i32
    return %c0_i32, %c0_i32_0 : i32, i32
  }
  func.func @transform_7(%arg0: i32) -> (i32, i32) {
    %c0_i32 = arith.constant 0 : i32
    %c0_i32_0 = arith.constant 0 : i32
    return %arg0, %c0_i32 : i32, i32
  }
}

</mosaic_0001>

<bundles_post_ra>
// kernel: actor_forward.1
= control target key start
LH: loop header
LB: loop body
LE: loop exit
PB: predicated region body
PF: predicated region fallthrough
CT: control target
= control target key end

     0   :  { %12 = vsyncpa [#allocation3], 0  ;;  %s776_s0 = inlined_call_operand.vmem [shape: f32[8,128], index: 0, kind: input, shape index: {}]   ;;  %s777_s1 = inlined_call_operand.hbm [shape: bf16[128,128], index: 1, kind: input, shape index: {}]   ;;  %s778_s2 = inlined_call_operand.vmem [shape: f32[1,128], index: 2, kind: input, shape index: {}]   ;;  %s779_s3 = inlined_call_operand.hbm [shape: bf16[128,128], index: 3, kind: input, shape index: {}]   ;;  %s780_s4 = inlined_call_operand.vmem [shape: f32[1,128], index: 4, kind: input, shape index: {}]   ;;  %s781_s5 = inlined_call_operand.hbm [shape: bf16[128,128], index: 5, kind: input, shape index: {}]   ;;  %s782_s6 = inlined_call_operand.vmem [shape: f32[1,128], index: 6, kind: input, shape index: {}]   ;;  %s783_s7 = inlined_call_operand.vmem [shape: f32[8,128], index: 7, kind: output, shape index: {}]  }
   0x1   :  { %13 = vsyncpa [#allocation5], 0  ;;  %s632_s24 = smov [#allocation4]   ;;  %s633_s26 = smov [#allocation2]  }
   0x2   :  { %s35_s25 = sshll.u32 %s632_s24, 4  ;;  %s21_s27 = sshll.u32 %s633_s26, 4  ;;  %s36_s25 = int_to_ptr.vmem [resolvable:$true] %s35_s25  ;;  %s679_s27 = int_to_ptr.vmem [resolvable:$true] %s21_s27 }
   0x3   :  { %s562_s30 = scalar_lea.hbm %s779_s3, 1024 }
   0x4   :  { %p563_p0 = scmp.ne.s32.totalorder %s779_s3, %s562_s30  ;;  %p566_p1 = scmp.lt.u32.totalorder %s562_s30, %s779_s3 }
   0x6   :  { %p568_p2 = pnand %p566_p1, %p563_p0 }
   0x8   :  { %571 = shalt.err (!%p568_p2)
}
   0x9   :  { %s572_s12 = scalar_lea.vmem %s36_s25, 1024  ;;  %p577_p4 = scmp.lt.s32.totalorder %s36_s25, %s36_s25 }
   0xa   :  { %p573_p3 = scmp.ne.s32.totalorder %s36_s25, %s572_s12  ;;  %p578_p5 = scmp.lt.s32.totalorder %s572_s12, %s572_s12 }
   0xc   :  { %p579_p6 = por %p578_p5, %p577_p4 }
   0xe   :  { %p580_p7 = pnand %p579_p6, %p573_p3 }
  0x10   :  { %583 = shalt.err (!%p580_p7)
}
  0x11   :  { %s634_s13 = smov 64   ;;  %s635_s14 = smov 4  }
  0x12   :  { %41 = dma.hbm_to_vmem [thread:$0]  %s779_s3, 1024, %s36_s25, [#allocation5], %s634_s13, %s634_s13, %s635_s14  }
  0x13   :  { %s584_s19 = scalar_lea.hbm %s777_s1, 1024 }
  0x14   :  { %p585_p8 = scmp.ne.s32.totalorder %s777_s1, %s584_s19  ;;  %p588_p9 = scmp.lt.u32.totalorder %s584_s19, %s777_s1 }
  0x16   :  { %p590_p10 = pnand %p588_p9, %p585_p8 }
  0x18   :  { %593 = shalt.err (!%p590_p10)
}
  0x19   :  { %s594_s24 = scalar_lea.vmem %s679_s27, 1024  ;;  %p599_p12 = scmp.lt.s32.totalorder %s679_s27, %s679_s27 }
  0x1a   :  { %p595_p11 = scmp.ne.s32.totalorder %s679_s27, %s594_s24  ;;  %p600_p13 = scmp.lt.s32.totalorder %s594_s24, %s594_s24 }
  0x1c   :  { %p601_p0 = por %p600_p13, %p599_p12 }
  0x1e   :  { %p602_p1 = pnand %p601_p0, %p595_p11 }
  0x20   :  { %605 = shalt.err (!%p602_p1)
}
  0x21   :  { %27 = dma.hbm_to_vmem [thread:$0]  %s777_s1, 1024, %s679_s27, [#allocation3], %s634_s13, %s634_s13, %s635_s14  }
  0x22   :  { %s636_s26 = smov [#allocation6]   ;;  %s606_s8 = scalar_lea.hbm %s781_s5, 1024 }
  0x23   :  { %s49_s28 = sshll.u32 %s636_s26, 4  ;;  %p607_p2 = scmp.ne.s32.totalorder %s781_s5, %s606_s8  ;;  %s50_s28 = int_to_ptr.vmem [resolvable:$true] %s49_s28 }
  0x24   :  { %p610_p3 = scmp.lt.u32.totalorder %s606_s8, %s781_s5 }
  0x26   :  { %p612_p4 = pnand %p610_p3, %p607_p2 }
  0x28   :  { %615 = shalt.err (!%p612_p4)
}
  0x29   :  { %s616_s15 = scalar_lea.vmem %s50_s28, 1024  ;;  %p621_p6 = scmp.lt.s32.totalorder %s50_s28, %s50_s28 }
  0x2a   :  { %p617_p5 = scmp.ne.s32.totalorder %s50_s28, %s616_s15  ;;  %p622_p7 = scmp.lt.s32.totalorder %s616_s15, %s616_s15 }
  0x2c   :  { %p623_p8 = por %p622_p7, %p621_p6 }
  0x2e   :  { %p624_p9 = pnand %p623_p8, %p617_p5 }
  0x30   :  { %627 = shalt.err (!%p624_p9)
}
  0x31   :  { %55 = dma.hbm_to_vmem [thread:$0]  %s781_s5, 1024, %s50_s28, [#allocation5], %s634_s13, %s634_s13, %s635_s14  }
  0x32   :  { %628 = dma.done.wait [#allocation3], 1024  }
  0x33   :  { %629 = vsyncadd [#allocation3], 4294966272 }
  0x34   :  { %630 = dma.done.wait [#allocation5], 2048  }
  0x35   :  { %631 = vsyncadd [#allocation5], 4294965248  ;;  %v637_v0 = vmov 0.0   ;;  %vm638_vm0 = vmmov 0   ;;  %v536_v1 = vld [vmem:[#allocation2] sm:$0xff]   ;;  %v537_v2 = vld [vmem:[#allocation2 + $0x8] sm:$0xff]  }
  0x36   :  { %469 = vmatprep.subr.bf16.mxu0 %v637_v0  ;;  %485 = vmatprep.mubr.msk.bf16.mxu0 %vm638_vm0, %v637_v0  ;;  %v538_v3 = vld [vmem:[#allocation2 + $0x10] sm:$0xff]   ;;  %v544_v4 = vld [vmem:[#allocation4] sm:$0xff]   ;;  %v539_v5 = vld [vmem:[#allocation2 + $0x18] sm:$0xff]  }
  0x37   :  { %489 = vmatprep.subr.bf16.mxu1 %v637_v0  ;;  %505 = vmatprep.mubr.msk.bf16.mxu1 %vm638_vm0, %v637_v0  ;;  %v545_v6 = vld [vmem:[#allocation4 + $0x8] sm:$0xff]   ;;  %v540_v7 = vld [vmem:[#allocation2 + $0x20] sm:$0xff]   ;;  %v546_v8 = vld [vmem:[#allocation4 + $0x10] sm:$0xff]  }
  0x38   :  { %470 = vmatpush3.bf16.msra.mxu0 %v536_v1  ;;  %490 = vmatpush3.bf16.msra.mxu1 %v544_v4  ;;  %v541_v9 = vld [vmem:[#allocation2 + $0x28] sm:$0xff]   ;;  %v547_v10 = vld [vmem:[#allocation4 + $0x18] sm:$0xff]   ;;  %v542_v11 = vld [vmem:[#allocation2 + $0x30] sm:$0xff]  }
  0x39   :  { %471 = vmatprep.subr.bf16.mxu0 %v637_v0  ;;  %491 = vmatprep.subr.bf16.mxu1 %v637_v0  ;;  %v548_v12 = vld [vmem:[#allocation4 + $0x20] sm:$0xff]   ;;  %v543_v13 = vld [vmem:[#allocation2 + $0x38] sm:$0xff]   ;;  %v549_v15 = vld [vmem:[#allocation4 + $0x28] sm:$0xff]  }
  0x3a   :  { %v68_v14 = vld [vmem:[%s776_s0] sm:$0xff]  ;;  %v550_v17 = vld [vmem:[#allocation4 + $0x30] sm:$0xff]   ;;  %v551_v18 = vld [vmem:[#allocation4 + $0x38] sm:$0xff]  }
  0x3b   :  { %v69_v16 = vpack.c.bf16 %v68_v14, %v68_v14  ;;  %v552_v19 = vld [vmem:[#allocation6] sm:$0xff]   ;;  %v553_v20 = vld [vmem:[#allocation6 + $0x8] sm:$0xff]   ;;  %v554_v21 = vld [vmem:[#allocation6 + $0x10] sm:$0xff]  }
  0x3c   :  { %472 = vmatpush3.bf16.msra.mxu0 %v537_v2  ;;  %492 = vmatpush3.bf16.msra.mxu1 %v545_v6  ;;  %v555_v22 = vld [vmem:[#allocation6 + $0x18] sm:$0xff]   ;;  %v556_v23 = vld [vmem:[#allocation6 + $0x20] sm:$0xff]   ;;  %v557_v24 = vld [vmem:[#allocation6 + $0x28] sm:$0xff]  }
  0x3d   :  { %473 = vmatprep.subr.bf16.mxu0 %v637_v0  ;;  %493 = vmatprep.subr.bf16.mxu1 %v637_v0  ;;  %v415_v25 = vld [vmem:[%s778_s2] ss:$0 sm:$0xff]  ;;  %v558_v33 = vld [vmem:[#allocation6 + $0x30] sm:$0xff]   ;;  %v559_v34 = vld [vmem:[#allocation6 + $0x38] sm:$0xff]  }
  0x3e   :  { %v424_v35 = vld [vmem:[%s780_s4] ss:$0 sm:$0xff] }
  0x3f   :  { %v433_v43 = vld [vmem:[%s782_s6] ss:$0 sm:$0xff] }
  0x40   :  { %474 = vmatpush3.bf16.msra.mxu0 %v538_v3  ;;  %494 = vmatpush3.bf16.msra.mxu1 %v546_v8 }
  0x41   :  { %475 = vmatprep.subr.bf16.mxu0 %v637_v0  ;;  %495 = vmatprep.subr.bf16.mxu1 %v637_v0 }
  0x44   :  { %476 = vmatpush3.bf16.msra.mxu0 %v539_v5  ;;  %496 = vmatpush3.bf16.msra.mxu1 %v547_v10 }
  0x45   :  { %477 = vmatprep.subr.bf16.mxu0 %v637_v0  ;;  %497 = vmatprep.subr.bf16.mxu1 %v637_v0 }
  0x48   :  { %478 = vmatpush3.bf16.msra.mxu0 %v540_v7  ;;  %498 = vmatpush3.bf16.msra.mxu1 %v548_v12 }
  0x49   :  { %479 = vmatprep.subr.bf16.mxu0 %v637_v0  ;;  %499 = vmatprep.subr.bf16.mxu1 %v637_v0 }
  0x4c   :  { %480 = vmatpush3.bf16.msra.mxu0 %v541_v9  ;;  %500 = vmatpush3.bf16.msra.mxu1 %v549_v15 }
  0x4d   :  { %481 = vmatprep.subr.bf16.mxu0 %v637_v0  ;;  %501 = vmatprep.subr.bf16.mxu1 %v637_v0 }
  0x50   :  { %482 = vmatpush3.bf16.msra.mxu0 %v542_v11  ;;  %502 = vmatpush3.bf16.msra.mxu1 %v550_v17 }
  0x51   :  { %483 = vmatprep.subr.bf16.mxu0 %v637_v0  ;;  %503 = vmatprep.subr.bf16.mxu1 %v637_v0 }
  0x54   :  { %484 = vmatpush3.bf16.msra.mxu0 %v543_v13  ;;  %504 = vmatpush3.bf16.msra.mxu1 %v551_v18 }
  0x55   :  { %509 = vmatprep.subr.bf16.mxu0 %v637_v0 }
  0x57   :  { %486 = vmatmul.mubr.bf16.vlgmr.msra.gmra.mrb[0].mxu0 %v69_v16 }
  0x58   :  { %525 = vmatprep.mubr.msk.bf16.mxu0 %vm638_vm0, %v637_v0  ;;  %510 = vmatpush3.bf16.msra.mxu0 %v552_v19 }
  0x59   :  { %511 = vmatprep.subr.bf16.mxu0 %v637_v0 }
  0x5c   :  { %512 = vmatpush3.bf16.msra.mxu0 %v553_v20 }
  0x5d   :  { %513 = vmatprep.subr.bf16.mxu0 %v637_v0 }
  0x60   :  { %514 = vmatpush3.bf16.msra.mxu0 %v554_v21 }
  0x61   :  { %515 = vmatprep.subr.bf16.mxu0 %v637_v0 }
  0x64   :  { %516 = vmatpush3.bf16.msra.mxu0 %v555_v22 }
  0x65   :  { %517 = vmatprep.subr.bf16.mxu0 %v637_v0 }
  0x68   :  { %518 = vmatpush3.bf16.msra.mxu0 %v556_v23 }
  0x69   :  { %519 = vmatprep.subr.bf16.mxu0 %v637_v0 }
  0x6c   :  { %520 = vmatpush3.bf16.msra.mxu0 %v557_v24 }
  0x6d   :  { %521 = vmatprep.subr.bf16.mxu0 %v637_v0 }
  0x70   :  { %522 = vmatpush3.bf16.msra.mxu0 %v558_v33 }
  0x71   :  { %523 = vmatprep.subr.bf16.mxu0 %v637_v0 }
  0x74   :  { %524 = vmatpush3.bf16.msra.mxu0 %v559_v34 }
 0x12a   :  { %v175_v26 = vpop.f32.mrb[0].mxu0 }
 0x12b   :  { %v176_v27 = vadd.f32 %v415_v25, %v175_v26  ;;  %v487_v28 = vpop.f32.mrb[1].mxu0 }
 0x12c   :  { %v178_v29 = vpop.f32.mrb[2].mxu0 }
 0x12d   :  { %v181_v30 = vmax.f32 %v176_v27, 0.0  ;;  %v488_v31 = vpop.f32.mrb[3].mxu0 }
 0x12f   :  { %v182_v32 = vpack.c.bf16 %v181_v30, %v181_v30 }
 0x131   :  { %506 = vmatmul.mubr.bf16.vlgmr.msra.gmra.mrb[0].mxu1 %v182_v32 }
 0x204   :  { %v288_v36 = vpop.f32.mrb[0].mxu1 }
 0x205   :  { %v289_v37 = vadd.f32 %v424_v35, %v288_v36  ;;  %v507_v38 = vpop.f32.mrb[1].mxu1 }
 0x206   :  { %v291_v39 = vpop.f32.mrb[2].mxu1 }
 0x207   :  { %v294_v40 = vmax.f32 %v289_v37, 0.0  ;;  %v508_v41 = vpop.f32.mrb[3].mxu1 }
 0x209   :  { %v295_v42 = vpack.c.bf16 %v294_v40, %v294_v40 }
 0x20b   :  { %526 = vmatmul.mubr.bf16.vlgmr.msra.gmra.mrb[4].mxu0 %v295_v42 }
 0x2de   :  { %v401_v44 = vpop.f32.mrb[4].mxu0 }
 0x2df   :  { %v402_v45 = vadd.f32 %v433_v43, %v401_v44  ;;  %v527_v46 = vpop.f32.mrb[5].mxu0 }
 0x2e0   :  { %v404_v47 = vpop.f32.mrb[6].mxu0 }
 0x2e1   :  { %560 = vtanh.f32 %v402_v45  ;;  %v528_v48 = vpop.f32.mrb[7].mxu0 }
 0x2eb   :  { %v561_v49 = vpop.eup %560 }
 0x2ec   :  { %408 = vst [vmem:[%s783_s7] sm:$0xff] %v561_v49 }
 0x2ed   :  { %413 = vsyncpa [#allocation3], 1 }
 0x2ee   :  { %414 = vsyncpa [#allocation5], 1 }

</bundles_post_ra>
